<compile_context>
chip_gen: v7x
topology: tpu7x:2x2x1
jax: 0.10.0
libtpu: 0.0.40
codegen_flags: <defaults>
</compile_context>

<pallas_src>
import functools
import math

import jax
import jax.numpy as jnp
from jax.experimental import pallas as pl
from jax.experimental.pallas import tpu as pltpu


def _round_up(x, m):
    return ((x + m - 1) // m) * m


# --------------------------------------------------------------------------- #
# One-time capability / hardware probes (cached; never wrap the real call).
# --------------------------------------------------------------------------- #
@functools.lru_cache(maxsize=None)
def _pipeline_mode_supported():
    """Probe once whether BlockSpec(pipeline_mode=pl.Buffered(k)) lowers."""
    if not hasattr(pl, "Buffered"):
        return False

    def _probe_kernel(x_ref, w_ref, o_ref):
        o_ref[...] = x_ref[...] + w_ref[...]

    try:
        f = pl.pallas_call(
            _probe_kernel,
            out_shape=jax.ShapeDtypeStruct((16, 128), jnp.float32),
            grid=(2,),
            in_specs=[
                pl.BlockSpec((8, 128), lambda i: (i, 0),
                             pipeline_mode=pl.Buffered(3)),
                pl.BlockSpec((8, 128), lambda i: (0, 0),
                             pipeline_mode=pl.Buffered(1)),
            ],
            out_specs=pl.BlockSpec((8, 128), lambda i: (i, 0)),
        )
        jax.jit(f).lower(
            jax.ShapeDtypeStruct((16, 128), jnp.float32),
            jax.ShapeDtypeStruct((8, 128), jnp.float32),
        ).compile()
        return True
    except Exception:  # capability probe only; real kernel never lands here
        return False


@functools.lru_cache(maxsize=None)
def _vmem_budget_bytes():
    """Generation-aware VMEM budget with headroom (7/8 of physical VMEM:
    ~56 MiB on v7x, ~112 MiB on v5e/v6e)."""
    try:
        cap = int(pltpu.get_tpu_info().vmem_capacity_bytes)
    except Exception:
        cap = 64 * 1024 * 1024  # conservative fallback, safe on every chip
    return max(32 * 1024 * 1024, (cap * 7) // 8)


# --------------------------------------------------------------------------- #
# Parameter preprocessing (run ONCE, outside the jitted forward).
# --------------------------------------------------------------------------- #
def prepare_metanet_params(w1, b1, w2, b2, *, weights_dtype=None):
    """Pad the hidden dim to a multiple of 128 lanes (zero columns/rows, which
    is numerically a no-op: relu(x@0+0)=0 and the matching w2 rows are 0) and
    optionally cast the weights (e.g. bf16 fast path).  Hoisted out of the
    forward so the per-call kernel sees already-lane-dense weights."""
    hid = w1.shape[1]
    hid_p = _round_up(hid, 128)
    if hid_p != hid:
        w1 = jnp.pad(w1, ((0, 0), (0, hid_p - hid)))
        b1 = jnp.pad(b1, ((0, 0), (0, hid_p - hid)))
        w2 = jnp.pad(w2, ((0, hid_p - hid), (0, 0)))
    if weights_dtype is not None:
        w1 = w1.astype(weights_dtype)
        w2 = w2.astype(weights_dtype)
    return w1, b1, w2, b2


# --------------------------------------------------------------------------- #
# Kernel.
# --------------------------------------------------------------------------- #
def _metanet_kernel(x_ref, w1_ref, b1_ref, w2_ref, b2_ref, o_ref):
    # Compute dtype follows the weight dtype:
    #   bf16 weights -> native-bf16 MXU fast path (f32 accumulation).
    #   f32  weights -> HIGHEST precision so the result matches the f32
    #                   PyTorch `x.float()` reference.
    cdt = w1_ref.dtype
    prec = jax.lax.Precision.HIGHEST if cdt == jnp.float32 else None

    x = x_ref[...].astype(cdt)
    # fc1: (tb, vis) @ (vis, hid_p) -> f32, + bias, ReLU.
    h = jnp.dot(x, w1_ref[...], preferred_element_type=jnp.float32,
                precision=prec)
    h = h + b1_ref[...].astype(jnp.float32)
    h = jnp.maximum(h, 0.0)
    # fc2: (tb, hid_p) @ (hid_p, ctx) -> f32, + bias.
    o = jnp.dot(h.astype(cdt), w2_ref[...], preferred_element_type=jnp.float32,
                precision=prec)
    o_ref[...] = (o + b2_ref[...].astype(jnp.float32)).astype(o_ref.dtype)


# --------------------------------------------------------------------------- #
# Forward wrapper.
# --------------------------------------------------------------------------- #
@functools.partial(
    jax.jit,
    static_argnames=("block_b", "out_dtype", "buffered_ok", "vmem_budget"))
def _metanet_forward_impl(x, w1, b1, w2, b2, *, block_b, out_dtype,
                          buffered_ok, vmem_budget):
    B, vis_dim = x.shape
    hid_p = w1.shape[1]
    ctx_dim = w2.shape[1]

    # Unprepared params: pad here as a fallback (prefer prepare_metanet_params
    # once, outside jit, to avoid per-call weight HBM traffic).
    if hid_p % 128 != 0:
        pad = _round_up(hid_p, 128) - hid_p
        w1 = jnp.pad(w1, ((0, 0), (0, pad)))
        b1 = jnp.pad(b1, ((0, 0), (0, pad)))
        w2 = jnp.pad(w2, ((0, pad), (0, 0)))
        hid_p += pad
    assert w1.shape == (vis_dim, hid_p) and w2.shape == (hid_p, ctx_dim)
    assert b1.shape == (1, hid_p) and b2.shape == (1, ctx_dim)

    # --- batch tiling ---------------------------------------------------------
    # Multiple-of-16 tiles (bf16 sublane packing); clamp so the "parallel"
    # batch grid has >= 2 steps whenever possible (v7x megacore: both TCs busy).
    block_b = _round_up(max(int(block_b), 16), 16)
    B16 = _round_up(B, 16)
    if B16 >= 32:
        block_b = min(block_b, _round_up((B16 + 1) // 2, 16))
    block_b = min(block_b, B16)
    Bp = _round_up(B16, block_b)
    if Bp != B:
        x = jnp.pad(x, ((0, Bp - B), (0, 0)))
    num_steps = Bp // block_b
    grid = (num_steps,)

    # Buffer depths: single-buffer resident weights, deepen the x stream.
    n_wbuf = 1 if buffered_ok else 2
    x_buffers = max(2, min(3, num_steps))

    # --- VMEM request (generation-aware cap with headroom) --------------------
    def nbytes(shape, dtype):
        return math.prod(shape) * jnp.dtype(dtype).itemsize

    weight_bytes = (nbytes((vis_dim, hid_p), w1.dtype)
                    + nbytes((1, hid_p), b1.dtype)
                    + nbytes((hid_p, ctx_dim), w2.dtype)
                    + nbytes((1, ctx_dim), b2.dtype))
    stream_bytes = (x_buffers * nbytes((block_b, vis_dim), x.dtype)
                    + 2 * nbytes((block_b, ctx_dim), out_dtype))
    work_bytes = (3 * nbytes((block_b, hid_p), jnp.float32)
                  + nbytes((block_b, ctx_dim), jnp.float32))
    needed = n_wbuf * weight_bytes + stream_bytes + work_bytes
    vmem_limit = int(min(vmem_budget, max(needed * 5 // 4, 32 * 1024 * 1024)))
    # TODO(synk): if resident weights alone exceed vmem_budget (very large
    # vis_dim/ctx_dim, esp. on v7x's 64 MiB), add a K grid axis over vis_dim
    # with an f32 accumulator + pl.when init/finalize instead of clamping.

    # --- advisory cost estimate ------------------------------------------------
    flops = 2 * Bp * vis_dim * hid_p + 2 * Bp * hid_p * ctx_dim
    bytes_accessed = (nbytes((Bp, vis_dim), x.dtype) + weight_bytes
                      + nbytes((Bp, ctx_dim), out_dtype))
    cost = pl.CostEstimate(flops=flops, transcendentals=0,
                           bytes_accessed=bytes_accessed)

    # --- BlockSpecs -------------------------------------------------------------
    if buffered_ok:
        x_spec = pl.BlockSpec((block_b, vis_dim), lambda i: (i, 0),
                              pipeline_mode=pl.Buffered(x_buffers))

        def resident(shape):
            # Constant block index -> stays in VMEM for the whole grid; single
            # buffer it so it occupies 1x (not 2x) its size.
            return pl.BlockSpec(shape, lambda i: (0, 0),
                                pipeline_mode=pl.Buffered(1))
    else:
        x_spec = pl.BlockSpec((block_b, vis_dim), lambda i: (i, 0))

        def resident(shape):
            return pl.BlockSpec(shape, lambda i: (0, 0))

    out = pl.pallas_call(
        _metanet_kernel,
        out_shape=jax.ShapeDtypeStruct((Bp, ctx_dim), out_dtype),
        grid_spec=pltpu.PrefetchScalarGridSpec(
            num_scalar_prefetch=0,
            grid=grid,
            in_specs=[
                x_spec,                          # streamed x tile
                resident((vis_dim, hid_p)),      # w1 (resident)
                resident((1, hid_p)),            # b1
                resident((hid_p, ctx_dim)),      # w2
                resident((1, ctx_dim)),          # b2
            ],
            out_specs=pl.BlockSpec((block_b, ctx_dim), lambda i: (i, 0)),
        ),
        compiler_params=pltpu.CompilerParams(
            # "parallel" lets megacore shard the batch grid across TCs on v7x.
            dimension_semantics=("parallel",),
            vmem_limit_bytes=vmem_limit,
        ),
        cost_estimate=cost,
    )(x, w1, b1, w2, b2)

    return out[:B] if Bp != B else out


def metanet_forward(x, w1, b1, w2, b2, *, block_b=512, out_dtype=jnp.float32):
    """MetaNet forward: relu(x @ w1 + b1) @ w2 + b2 with f32 accumulation.

    x: (B, vis_dim); w1: (vis_dim, hid[_padded]); b1: (1, hid[_padded]);
    w2: (hid[_padded], ctx_dim); b2: (1, ctx_dim).  Returns (B, ctx_dim) in
    `out_dtype` (default f32).  Pass params through prepare_metanet_params()
    once for the lane-padded / bf16 fast path; f32 weights give PyTorch-exact
    numerics (HIGHEST-precision MXU passes).
    """
    return _metanet_forward_impl(
        x, w1, b1, w2, b2,
        block_b=block_b, out_dtype=out_dtype,
        buffered_ok=_pipeline_mode_supported(),
        vmem_budget=_vmem_budget_bytes())


# --------------------------------------------------------------------------- #
# Init + pure-JAX reference.
# --------------------------------------------------------------------------- #
def init_metanet_params(key, vis_dim, ctx_dim):
    """nn.Linear-style init: U(-1/sqrt(fan_in), +1/sqrt(fan_in)), f32."""
    hid = vis_dim // 16
    k1, k2, k3, k4 = jax.random.split(key, 4)
    lim1 = 1.0 / math.sqrt(vis_dim)
    lim2 = 1.0 / math.sqrt(hid)
    w1 = jax.random.uniform(k1, (vis_dim, hid), jnp.float32, -lim1, lim1)
    b1 = jax.random.uniform(k2, (1, hid), jnp.float32, -lim1, lim1)
    w2 = jax.random.uniform(k3, (hid, ctx_dim), jnp.float32, -lim2, lim2)
    b2 = jax.random.uniform(k4, (1, ctx_dim), jnp.float32, -lim2, lim2)
    return w1, b1, w2, b2


def metanet_ref(x, w1, b1, w2, b2):
    x = x.astype(jnp.float32)
    w1 = w1.astype(jnp.float32)
    w2 = w2.astype(jnp.float32)
    h = jnp.maximum(
        jnp.dot(x, w1, precision=jax.lax.Precision.HIGHEST)
        + b1.astype(jnp.float32), 0.0)
    return (jnp.dot(h, w2, precision=jax.lax.Precision.HIGHEST)
            + b2.astype(jnp.float32))


if __name__ == "__main__":
    # MetaNet(vis_dim=512, ctx_dim=128) -> hidden = 512 // 16 = 32.
    # B=32 keeps shapes small; the megacore clamp gives a 2-step batch grid
    # (block_b=16) so both v7x TensorCores are exercised.
    B, VIS_DIM, CTX_DIM = 32, 512, 128

    key = jax.random.PRNGKey(0)
    kx, kp = jax.random.split(key)
    x = jax.random.normal(kx, (B, VIS_DIM), dtype=jnp.bfloat16)

    w1, b1, w2, b2 = init_metanet_params(kp, VIS_DIM, CTX_DIM)
    # One-time param prep hoisted out of the jitted forward: pad hidden dim to
    # 128 lanes and cast weights to bf16 (native-bf16 MXU fast path).
    pw1, pb1, pw2, pb2 = prepare_metanet_params(
        w1, b1, w2, b2, weights_dtype=jnp.bfloat16)

    out = metanet_forward(x, pw1, pb1, pw2, pb2)
    out = jax.block_until_ready(out)

    # Reference uses the same (padded, bf16) parameter values upcast to f32;
    # remaining delta is bf16 MXU product rounding only.
    ref = metanet_ref(x, pw1, pb1, pw2, pb2)
    assert out.shape == (B, CTX_DIM) and out.dtype == jnp.float32
    err = float(jnp.max(jnp.abs(out - ref)))
    assert jnp.allclose(out, ref, atol=2e-2, rtol=2e-2), err

    print("KERNEL_OK")
</pallas_src>

<mosaic_0001>
module attributes {stable_mosaic.version = 11 : i64} {
  func.func @_metanet_kernel(%arg0: i32, %arg1: memref<16x512xbf16, #tpu.memory_space<vmem>>, %arg2: memref<512x128xbf16, #tpu.memory_space<vmem>>, %arg3: memref<1x128xf32, #tpu.memory_space<vmem>>, %arg4: memref<128x128xbf16, #tpu.memory_space<vmem>>, %arg5: memref<1x128xf32, #tpu.memory_space<vmem>>, %arg6: memref<16x128xf32, #tpu.memory_space<vmem>>) attributes {dimension_semantics = [#tpu.dimension_semantics<parallel>], iteration_bounds = array<i64: 2>, scalar_prefetch = 0 : i64, scratch_operands = 0 : i64, tpu.core_type = #tpu.core_type<tc>, window_params = [{transform_indices = @transform_0, window_bounds = array<i64: 16, 512>}, {pipeline_mode = #tpu.pipeline_mode<synchronous>, transform_indices = @transform_1, window_bounds = array<i64: 512, 128>}, {pipeline_mode = #tpu.pipeline_mode<synchronous>, transform_indices = @transform_2, window_bounds = array<i64: 1, 128>}, {pipeline_mode = #tpu.pipeline_mode<synchronous>, transform_indices = @transform_3, window_bounds = array<i64: 128, 128>}, {pipeline_mode = #tpu.pipeline_mode<synchronous>, transform_indices = @transform_4, window_bounds = array<i64: 1, 128>}, {transform_indices = @transform_5, window_bounds = array<i64: 16, 128>}]} {
    %c0 = arith.constant 0 : index
    %c0_0 = arith.constant 0 : index
    %0 = vector.load %arg1[%c0, %c0_0] : memref<16x512xbf16, #tpu.memory_space<vmem>>, vector<16x512xbf16>
    %c0_1 = arith.constant 0 : index
    %c0_2 = arith.constant 0 : index
    %1 = vector.load %arg2[%c0_1, %c0_2] : memref<512x128xbf16, #tpu.memory_space<vmem>>, vector<512x128xbf16>
    %cst = arith.constant dense<0.000000e+00> : vector<16x128xf32>
    %2 = tpu.matmul %0, %1, %cst {dimension_numbers = #tpu.dot_dimension_numbers<[1], [0], [0], [1], [0, 0, 1, 1], [], []>} : vector<16x512xbf16>, vector<512x128xbf16>, vector<16x128xf32> -> vector<16x128xf32>
    %c0_3 = arith.constant 0 : index
    %c0_4 = arith.constant 0 : index
    %3 = vector.load %arg3[%c0_3, %c0_4] : memref<1x128xf32, #tpu.memory_space<vmem>>, vector<1x128xf32>
    %4 = vector.broadcast %3 : vector<1x128xf32> to vector<16x128xf32>
    %5 = arith.addf %2, %4 : vector<16x128xf32>
    %cst_5 = arith.constant 0.000000e+00 : f32
    %6 = vector.broadcast %cst_5 : f32 to vector<16x128xf32>
    %7 = arith.maximumf %5, %6 : vector<16x128xf32>
    %8 = arith.truncf %7 : vector<16x128xf32> to vector<16x128xbf16>
    %c0_6 = arith.constant 0 : index
    %c0_7 = arith.constant 0 : index
    %9 = vector.load %arg4[%c0_6, %c0_7] : memref<128x128xbf16, #tpu.memory_space<vmem>>, vector<128x128xbf16>
    %cst_8 = arith.constant dense<0.000000e+00> : vector<16x128xf32>
    %10 = tpu.matmul %8, %9, %cst_8 {dimension_numbers = #tpu.dot_dimension_numbers<[1], [0], [0], [1], [0, 0, 1, 1], [], []>} : vector<16x128xbf16>, vector<128x128xbf16>, vector<16x128xf32> -> vector<16x128xf32>
    %c0_9 = arith.constant 0 : index
    %c0_10 = arith.constant 0 : index
    %11 = vector.load %arg5[%c0_9, %c0_10] : memref<1x128xf32, #tpu.memory_space<vmem>>, vector<1x128xf32>
    %12 = vector.broadcast %11 : vector<1x128xf32> to vector<16x128xf32>
    %13 = arith.addf %10, %12 : vector<16x128xf32>
    %c0_11 = arith.constant 0 : index
    %c0_12 = arith.constant 0 : index
    %14 = vector.load %arg6[%c0_11, %c0_12] : memref<16x128xf32, #tpu.memory_space<vmem>>, vector<16x128xf32>
    tpu.vector_store %arg6[%c0_11, %c0_12], %13 {strides = array<i32>} : memref<16x128xf32, #tpu.memory_space<vmem>>, vector<16x128xf32>,
    return
  }
  func.func @transform_0(%arg0: i32) -> (i32, i32) {
    %c0_i32 = arith.constant 0 : i32
    %c0_i32_0 = arith.constant 0 : i32
    return %arg0, %c0_i32 : i32, i32
  }
  func.func @transform_1(%arg0: i32) -> (i32, i32) {
    %c0_i32 = arith.constant 0 : i32
    %c0_i32_0 = arith.constant 0 : i32
    %c0_i32_1 = arith.constant 0 : i32
    return %c0_i32, %c0_i32_0 : i32, i32
  }
  func.func @transform_2(%arg0: i32) -> (i32, i32) {
    %c0_i32 = arith.constant 0 : i32
    %c0_i32_0 = arith.constant 0 : i32
    %c0_i32_1 = arith.constant 0 : i32
    return %c0_i32, %c0_i32_0 : i32, i32
  }
  func.func @transform_3(%arg0: i32) -> (i32, i32) {
    %c0_i32 = arith.constant 0 : i32
    %c0_i32_0 = arith.constant 0 : i32
    %c0_i32_1 = arith.constant 0 : i32
    return %c0_i32, %c0_i32_0 : i32, i32
  }
  func.func @transform_4(%arg0: i32) -> (i32, i32) {
    %c0_i32 = arith.constant 0 : i32
    %c0_i32_0 = arith.constant 0 : i32
    %c0_i32_1 = arith.constant 0 : i32
    return %c0_i32, %c0_i32_0 : i32, i32
  }
  func.func @transform_5(%arg0: i32) -> (i32, i32) {
    %c0_i32 = arith.constant 0 : i32
    %c0_i32_0 = arith.constant 0 : i32
    return %arg0, %c0_i32 : i32, i32
  }
}

</mosaic_0001>

<bundles_post_ra>
// kernel: _metanet_forward_impl.1
= control target key start
LH: loop header
LB: loop body
LE: loop exit
PB: predicated region body
PF: predicated region fallthrough
CT: control target
= control target key end

     0   :  { %10 = vsyncpa [#allocation3], 0  ;;  %s1577_s0 = inlined_call_operand.hbm [shape: bf16[32,512], index: 0, kind: input, shape index: {}]   ;;  %s1578_s1 = inlined_call_operand.hbm [shape: bf16[512,128], index: 1, kind: input, shape index: {}]   ;;  %s1579_s2 = inlined_call_operand.vmem [shape: f32[1,128], index: 2, kind: input, shape index: {}]   ;;  %s1580_s3 = inlined_call_operand.hbm [shape: bf16[128,128], index: 3, kind: input, shape index: {}]   ;;  %s1581_s4 = inlined_call_operand.vmem [shape: f32[1,128], index: 4, kind: input, shape index: {}]   ;;  %s1582_s5 = inlined_call_operand.hbm [shape: f32[32,128], index: 5, kind: output, shape index: {}]  }
   0x1   :  { %12 = vsyncpa [#allocation3 + $0x1], 0 }
   0x2   :  { %13 = vsyncpa [#allocation6], 0 }
   0x3   :  { %14 = vsyncpa [#allocation4], 0 }
   0x4   :  { %16 = vsyncpa [#allocation4 + $0x1], 0  ;;  %s1330_s18 = smov 0   ;;  %s1332_s19 = smov 0  }
   0x5   :  { %s1334_s20 = smov 0   ;;  %s1336_s21 = smov 0  }
   0x6 LB: > { %s1351_s22 = sadd.s32 4294967295, %s1286_s21   ;;  %s868_s23 = sadd.s32 4294967294, %s1286_s21   ;;  %s1286_s21 = sphi %s1336_s21, %s1602_s21   ;;  %s1282_s20 = sphi %s1334_s20, %s1601_s20   ;;  %s1278_s19 = sphi %s1332_s19, %s1600_s19   ;;  %s1274_s18 = sphi %s1330_s18, %s1599_s18  }
   0x7   : > { %p42_p0 = scmp.ne.s32.totalorder %s1278_s19, %s1274_s18  ;;  %p1583_p1 = scmp.eq.s32.totalorder %s1351_s22, 0 }
   0x8   : > { %p156_p3 = scmp.eq.s32.totalorder %s868_s23, 1  ;;  %p869_p5 = scmp.ge.s32.totalorder %s1286_s21, 1 }
   0x9   : > { %p1360_p4 = por %p1583_p1, %p42_p0  ;;  %p163_p7 = scmp.lt.s32.totalorder %s1286_s21, 3 }
   0xa   : > { %p1365_p6 = por %p156_p3, %p42_p0  ;;  %s1288_s27 = smov [#allocation5]  }
   0xb   : > { %s1586_s24 = scalar_select %p1360_p4, 1, 0 }
   0xc   : > { %s1587_s25 = scalar_select %p1365_p6, 1, 0 }
   0xd   : > { %p1370_p8 = pnand %p869_p5, %p163_p7  ;;  %s175_s28 = sshll.u32 %s1288_s27, 4  ;;  %s1374_s28 = int_to_ptr.vmem [resolvable:$true] %s175_s28 }
   0xe   : > { %s1289_s30 = smov [#allocation7]   ;;  %s1130_s9 = scalar_lea.hbm %s1578_s1, 4096 }
   0xf   : > { %p1021_p9 = pneg %p1370_p8  ;;  %s191_s6 = sshll.u32 %s1289_s30, 4  ;;  %s1385_s6 = int_to_ptr.vmem [resolvable:$true] %s191_s6 }
  0x10   : > { %p1131_p12 = scmp.ne.s32.totalorder %s1578_s1, %s1130_s9  ;;  %p1137_p5 = scmp.lt.u32.totalorder %s1130_s9, %s1578_s1 }
  0x11   : > { %p1381_p11 = pnand %p1021_p9, %p1583_p1 }
  0x13   : > { %p1132_p13 = pneg %p1381_p11 }
  0x15   : > { %p1133_p0 = pnand %p1132_p13, %p1131_p12 }
  0x17   : > { %p1134_p3 = pneg %p1133_p0 }
  0x19   : > { %p1139_p7 = pnand %p1137_p5, %p1134_p3 }
  0x1b   : > { %1142 = shalt.err (!%p1139_p7)
}
  0x1c   : > { %s1143_s14 = scalar_lea.vmem %s1374_s28, 4096  ;;  %p1151_p2 = scmp.lt.s32.totalorder %s1374_s28, %s1374_s28 }
  0x1d   : > { %p1144_p9 = scmp.ne.s32.totalorder %s1374_s28, %s1143_s14  ;;  %p1152_p12 = scmp.lt.s32.totalorder %s1143_s14, %s1143_s14 }
  0x1f   : > { %p1146_p10 = pnand %p1144_p9, %p1132_p13  ;;  %p1153_p0 = por %p1152_p12, %p1151_p2 }
  0x21   : > { %p1147_p1 = pneg %p1146_p10 }
  0x23   : > { %p1154_p6 = pnand %p1153_p0, %p1147_p1 }
  0x25   : > { %1157 = shalt.err (!%p1154_p6)
}
  0x26   : > { %s1290_s15 = smov 64   ;;  %s1291_s16 = smov 4  }
  0x27   : > { %1024 = dma.hbm_to_vmem [thread:$0]  (!%p1381_p11), %s1578_s1, 4096, %s1374_s28, [#allocation6], %s1290_s15, %s1290_s15, %s1291_s16  }
  0x28   : > { %s1158_s7 = scalar_lea.hbm %s1580_s3, 1024 }
  0x29   : > { %p1159_p2 = scmp.ne.s32.totalorder %s1580_s3, %s1158_s7  ;;  %p1165_p10 = scmp.lt.u32.totalorder %s1158_s7, %s1580_s3 }
  0x2b   : > { %p1161_p1 = pnand %p1159_p2, %p1132_p13 }
  0x2d   : > { %p1162_p6 = pneg %p1161_p1 }
  0x2f   : > { %p1167_p3 = pnand %p1165_p10, %p1162_p6 }
  0x31   : > { %1170 = shalt.err (!%p1167_p3)
}
  0x32   : > { %s1171_s28 = scalar_lea.vmem %s1385_s6, 1024  ;;  %p1179_p12 = scmp.lt.s32.totalorder %s1385_s6, %s1385_s6 }
  0x33   : > { %p1172_p5 = scmp.ne.s32.totalorder %s1385_s6, %s1171_s28  ;;  %p1180_p0 = scmp.lt.s32.totalorder %s1171_s28, %s1171_s28 }
  0x35   : > { %p1174_p7 = pnand %p1172_p5, %p1132_p13  ;;  %p1181_p2 = por %p1180_p0, %p1179_p12 }
  0x37   : > { %p1175_p9 = pneg %p1174_p7 }
  0x39   : > { %p1182_p1 = pnand %p1181_p2, %p1175_p9 }
  0x3b   : > { %1185 = shalt.err (!%p1182_p1)
}
  0x3c   : > { %1027 = dma.hbm_to_vmem [thread:$0]  (!%p1381_p11), %s1580_s3, 1024, %s1385_s6, [#allocation6], %s1290_s15, %s1290_s15, %s1291_s16  }
  0x3d   : > { %s1440_s14 = sadd.s32 1, %s1286_s21   ;;  %s29_s29 = sadd.s32 1, %s1282_s20 }
  0x3e   : > { %s26_s17 = ssub.s32 %s1286_s21, %s1440_s14  ;;  %p36_p13 = scmp.ne.s32.totalorder %s1282_s20, %s1278_s19 }
  0x3f   : > { %p27_p6 = scmp.eq.s32.totalorder %s26_s17, 0  ;;  %p37_p10 = scmp.eq.s32.totalorder %s1286_s21, 0 }
  0x40   : > { %p1590_p3 = scmp.eq.s32.totalorder %s1351_s22, 1  ;;  %p1038_p7 = scmp.lt.s32.totalorder %s1286_s21, 2 }
  0x41   : > { %s1456_s27 = scalar_select %p27_p6, %s1282_s20, %s29_s29  }
  0x42   : > { %p1450_p5 = por %p1590_p3, %p36_p13  ;;  %p38_p9 = por %p37_p10, %p36_p13 }
  0x43   : > { %s208_s30 = sand.u32 1, %s1282_s20   ;;  %s934_s6 = sshll.u32 %s1286_s21, 9 }
  0x44   : > { %s1591_s23 = scalar_select %p1450_p5, 1, 0 }
  0x45   : > { %s873_s7 = sshll.u32 %s208_s30, 5  ;;  %s1463_s8 = scalar_lea.hbm %s1577_s0, %s934_s6 }
  0x46   : > { %s212_s9 = scalar_lea.vmem [#allocation2], %s873_s7  ;;  %p1467_p11 = pnand %p1038_p7, %p38_p9 }
  0x47   : > { %s220_s10 = sshll.u32 %s212_s9, 4  ;;  %s1471_s28 = scalar_lea.sflag [#allocation3], %s208_s30  ;;  %s1465_s10 = int_to_ptr.vmem [resolvable:$true] %s220_s10 }
  0x48   : > { %s1186_s12 = scalar_lea.hbm %s1463_s8, 512  ;;  %p1188_p0 = pneg %p1467_p11 }
  0x49   : > { %p1187_p12 = scmp.ne.s32.totalorder %s1463_s8, %s1186_s12  ;;  %s1191_s17 = scalar_lea.hbm %s1577_s0, 1024 }
  0x4a   : > { %p1192_p13 = scmp.lt.u32.totalorder %s1463_s8, %s1577_s0  ;;  %p1193_p6 = scmp.lt.u32.totalorder %s1191_s17, %s1186_s12 }
  0x4b   : > { %p1189_p2 = pnand %p1188_p0, %p1187_p12  ;;  %p1195_p3 = scmp.lt.u32.totalorder %s1186_s12, %s1463_s8 }
  0x4c   : > { %p1194_p10 = por %p1193_p6, %p1192_p13 }
  0x4d   : > { %p1190_p1 = pneg %p1189_p2 }
  0x4e   : > { %p1196_p7 = por %p1195_p3, %p1194_p10 }
  0x50   : > { %p1197_p9 = pnand %p1196_p7, %p1190_p1 }
  0x52   : > { %1200 = shalt.err (!%p1197_p9)
}
  0x53   : > { %s1201_s30 = scalar_lea.vmem %s1465_s10, 512  ;;  %s1292_s15 = smov [#allocation2]  }
  0x54   : > { %p1202_p12 = scmp.ne.s32.totalorder %s1465_s10, %s1201_s30  ;;  %s1206_s16 = sshll.u32 %s1292_s15, 4  ;;  %s1207_s16 = int_to_ptr.vmem [resolvable:$false] %s1206_s16 }
  0x55   : > { %s1208_s9 = scalar_lea.vmem %s1207_s16, 1024  ;;  %p1209_p4 = scmp.lt.s32.totalorder %s1465_s10, %s1207_s16 }
  0x56   : > { %p1204_p2 = pnand %p1202_p12, %p1188_p0  ;;  %p1210_p13 = scmp.lt.s32.totalorder %s1208_s9, %s1201_s30 }
  0x58   : > { %p1205_p5 = pneg %p1204_p2  ;;  %p1211_p6 = por %p1210_p13, %p1209_p4 }
  0x5a   : > { %p1212_p10 = pnand %p1211_p6, %p1205_p5 }
  0x5c   : > { %1215 = shalt.err (!%p1212_p10)
}
  0x5d   : > { %s1293_s12 = smov 256   ;;  %s1294_s13 = smov 16  }
  0x5e   : > { %1031 = dma.hbm_to_vmem [thread:$0]  (!%p1467_p11), %s1463_s8, 512, %s1465_s10, %s1471_s28, %s1293_s12, %s1293_s12, %s1294_s13  }
  0x5f   : > { %232 = sbr.rel (%p1370_p8) target bundleno = 596 (0x254), region = 40  ;;  %s1502_s29 = sand.u32 (!%p1370_p8), 1, %s1278_s19  }
  0x60   : > { %s878_s17 = sshll.u32 (!%p1370_p8), %s1502_s29, 5  ;;  %s235_s7 = scalar_lea.sflag (!%p1370_p8), [#allocation3], %s1502_s29 }
  0x61   : > { %s1506_s6 = scalar_lea.vmem (!%p1370_p8), [#allocation2], %s878_s17  ;;  %p1593_p4 = scmp.ne.s32.totalorder (!%p1370_p8), %s1586_s24, 0 }
  0x66   : > { %1261 = dma.done.wait (%p1593_p4), %s235_s7, 512  }
  0x67   : > { %1263 = vsyncadd (%p1593_p4), %s235_s7, 4294966784  ;;  %p1594_p5 = scmp.eq.s32.totalorder %s1351_s22, 0 }
  0x69   : > { %1265 = dma.done.wait (%p1594_p5), [#allocation6], 5120   ;;  %p1595_p8 = pmov %p1594_p5 }
  0x6a   : > { %v1084_v0 = vld [vmem:[#allocation5 + $0x40] sm:$0xff]   ;;  %v1088_v4 = vld [vmem:[#allocation5 + $0x48] sm:$0xff]   ;;  %v1092_v8 = vld [vmem:[#allocation5 + $0x50] sm:$0xff]   ;;  %v1295_v34 = vmov 0.0   ;;  %vm1296_vm0 = vmmov 0   ;;  %s881_s8 = sshll.u32 %s1502_s29, 4 }
  0x6b   : > { %1267 = vsyncadd (%p1595_p8), [#allocation6], 4294962176  ;;  %v1085_v1 = vld [vmem:[#allocation5 + $0xc0] sm:$0xff]   ;;  %936 = vmatprep.subr.bf16.mxu0 %v1084_v0  ;;  %v1089_v5 = vld [vmem:[#allocation5 + $0xc8] sm:$0xff]   ;;  %s272_s28 = scalar_lea.vmem [#allocation8], %s881_s8  ;;  %s935_s15 = sshll.u32 %s1351_s22, 8 }
  0x6c   : > { %v1086_v2 = vld [vmem:[#allocation5] sm:$0xff]   ;;  %958 = vmatprep.subr.bf16.mxu1 %v1085_v1  ;;  %v1090_v6 = vld [vmem:[#allocation5 + $0x8] sm:$0xff]   ;;  %v1093_v9 = vld [vmem:[#allocation5 + $0xd0] sm:$0xff]   ;;  %s776_s30 = sshll.u32 %s272_s28, 4  ;;  %s1533_s12 = scalar_lea.hbm %s1582_s5, %s935_s15  ;;  %s1528_s30 = int_to_ptr.vmem [resolvable:$true] %s776_s30 }
  0x6d   : > { %v1087_v3 = vld [vmem:[#allocation5 + $0x80] sm:$0xff]   ;;  %937 = vmatpush3.bf16.msra.mxu0 %v1086_v2  ;;  %v1091_v7 = vld [vmem:[#allocation5 + $0x88] sm:$0xff]   ;;  %v1094_v10 = vld [vmem:[#allocation5 + $0x10] sm:$0xff]   ;;  %s763_s13 = scalar_lea.sflag [#allocation4], %s1502_s29  ;;  %s1216_s22 = scalar_lea.vmem %s1528_s30, 256 }
  0x6e   : > { %959 = vmatpush3.bf16.msra.mxu1 %v1087_v3  ;;  %938 = vmatprep.subr.bf16.mxu0 %v1088_v4  ;;  %v1095_v11 = vld [vmem:[#allocation5 + $0x90] sm:$0xff]   ;;  %v1096_v12 = vld [vmem:[#allocation5 + $0x58] sm:$0xff]   ;;  %v1100_v16 = vld [vmem:[#allocation5 + $0x60] sm:$0xff]   ;;  %p1217_p11 = scmp.ne.s32.totalorder %s1528_s30, %s1216_s22  ;;  %p1596_p0 = scmp.ne.s32.totalorder %s1591_s23, 0 }
  0x6f   : > { %960 = vmatprep.subr.bf16.mxu1 %v1089_v5  ;;  %v1097_v13 = vld [vmem:[#allocation5 + $0xd8] sm:$0xff]   ;;  %v1101_v17 = vld [vmem:[#allocation5 + $0xe0] sm:$0xff]   ;;  %v1104_v20 = vld [vmem:[#allocation5 + $0x68] sm:$0xff]   ;;  %s1297_s17 = smov [#allocation8]  }
  0x70   : > { %v1098_v14 = vld [vmem:[#allocation5 + $0x18] sm:$0xff]   ;;  %v1102_v18 = vld [vmem:[#allocation5 + $0x20] sm:$0xff]   ;;  %v1105_v21 = vld [vmem:[#allocation5 + $0xe8] sm:$0xff]   ;;  %p1218_p1 = pnand %p1217_p11, %p1596_p0  ;;  %s1220_s7 = sshll.u32 %s1297_s17, 4  ;;  %s1221_s7 = int_to_ptr.vmem [resolvable:$false] %s1220_s7 }
  0x71   : > { %939 = vmatpush3.bf16.msra.mxu0 %v1090_v6  ;;  %v1099_v15 = vld [vmem:[#allocation5 + $0x98] sm:$0xff]   ;;  %v1103_v19 = vld [vmem:[#allocation5 + $0xa0] sm:$0xff]   ;;  %v1106_v22 = vld [vmem:[#allocation5 + $0x28] sm:$0xff]   ;;  %p1223_p7 = scmp.lt.s32.totalorder %s1528_s30, %s1221_s7 }
  0x72   : > { %961 = vmatpush3.bf16.msra.mxu1 %v1091_v7  ;;  %940 = vmatprep.subr.bf16.mxu0 %v1092_v8  ;;  %v1107_v23 = vld [vmem:[#allocation5 + $0xa8] sm:$0xff]   ;;  %v1108_v24 = vld [vmem:[#allocation5 + $0x70] sm:$0xff]   ;;  %v1112_v28 = vld [vmem:[#allocation5 + $0x78] sm:$0xff]   ;;  %p1219_p3 = pneg %p1218_p1 }
  0x73   : > { %962 = vmatprep.subr.bf16.mxu1 %v1093_v9  ;;  %v1109_v25 = vld [vmem:[#allocation5 + $0xf0] sm:$0xff]   ;;  %v1113_v29 = vld [vmem:[#allocation5 + $0xf8] sm:$0xff]   ;;  %v1122_v37 = vld [vmem:[#allocation7] sm:$0xff]  }
  0x74   : > { %v1110_v26 = vld [vmem:[#allocation5 + $0x30] sm:$0xff]   ;;  %v1114_v30 = vld [vmem:[#allocation5 + $0x38] sm:$0xff]   ;;  %v1123_v38 = vld [vmem:[#allocation7 + $0x8] sm:$0xff]  }
  0x75   : > { %941 = vmatpush3.bf16.msra.mxu0 %v1094_v10  ;;  %v1111_v27 = vld [vmem:[#allocation5 + $0xb0] sm:$0xff]   ;;  %v1115_v31 = vld [vmem:[#allocation5 + $0xb8] sm:$0xff]   ;;  %v1126_v41 = vld [vmem:[#allocation7 + $0x20] sm:$0xff]  }
  0x76   : > { %963 = vmatpush3.bf16.msra.mxu1 %v1095_v11  ;;  %942 = vmatprep.subr.bf16.mxu0 %v1096_v12  ;;  %v1116_v32 = vld [vmem:[%s1506_s6] ss:$16 sps:$4 sm:$0xff]   ;;  %v1118_v33 = vld [vmem:[%s1506_s6 + $0x4] ss:$16 sps:$4 sm:$0xff]   ;;  %v1119_v35 = vld [vmem:[%s1506_s6 + $0x8] ss:$16 sps:$4 sm:$0xff]  }
  0x77   : > { %964 = vmatprep.subr.bf16.mxu1 %v1097_v13  ;;  %v1121_v36 = vld [vmem:[%s1506_s6 + $0xc] ss:$16 sps:$4 sm:$0xff]   ;;  %595 = vmatprep.mubr.bf16.mxu0 %v1118_v33  ;;  %v1124_v39 = vld [vmem:[#allocation7 + $0x10] sm:$0xff]   ;;  %v882_v47 = vld [vmem:[%s1579_s2] ss:$0 sm:$0xff]  ;;  %s1222_s6 = scalar_lea.vmem %s1221_s7, 512 }
  0x78   : > { %636 = vmatprep.mubr.bf16.mxu1 %v1121_v36  ;;  %v1125_v40 = vld [vmem:[#allocation7 + $0x18] sm:$0xff]   ;;  %v1127_v42 = vld [vmem:[#allocation7 + $0x28] sm:$0xff]   ;;  %v1128_v43 = vld [vmem:[#allocation7 + $0x30] sm:$0xff]   ;;  %p1224_p9 = scmp.lt.s32.totalorder %s1222_s6, %s1216_s22 }
  0x79   : > { %943 = vmatpush3.bf16.msra.mxu0 %v1098_v14  ;;  %v1129_v44 = vld [vmem:[#allocation7 + $0x38] sm:$0xff]   ;;  %v919_v1 = vld [vmem:[%s1581_s4] ss:$0 sm:$0xff] }
  0x7a   : > { %965 = vmatpush3.bf16.msra.mxu1 %v1099_v15  ;;  %944 = vmatprep.subr.bf16.mxu0 %v1100_v16  ;;  %p1225_p12 = por %p1224_p9, %p1223_p7 }
  0x7b   : > { %966 = vmatprep.subr.bf16.mxu1 %v1101_v17 }
  0x7c   : > { %p1226_p2 = pnand %p1225_p12, %p1219_p3 }
  0x7d   : > { %945 = vmatpush3.bf16.msra.mxu0 %v1102_v18 }
  0x7e   : > { %967 = vmatpush3.bf16.msra.mxu1 %v1103_v19  ;;  %946 = vmatprep.subr.bf16.mxu0 %v1104_v20 }
  0x7f   : > { %968 = vmatprep.subr.bf16.mxu1 %v1105_v21 }
  0x81   : > { %947 = vmatpush3.bf16.msra.mxu0 %v1106_v22 }
  0x82   : > { %969 = vmatpush3.bf16.msra.mxu1 %v1107_v23  ;;  %948 = vmatprep.subr.bf16.mxu0 %v1108_v24 }
  0x83   : > { %970 = vmatprep.subr.bf16.mxu1 %v1109_v25 }
  0x85   : > { %949 = vmatpush3.bf16.msra.mxu0 %v1110_v26 }
  0x86   : > { %971 = vmatpush3.bf16.msra.mxu1 %v1111_v27  ;;  %950 = vmatprep.subr.bf16.mxu0 %v1112_v28 }
  0x87   : > { %972 = vmatprep.subr.bf16.mxu1 %v1113_v29 }
  0x89   : > { %951 = vmatpush3.bf16.msra.mxu0 %v1114_v30 }
  0x8a   : > { %973 = vmatpush3.bf16.msra.mxu1 %v1115_v31  ;;  %989 = vmatprep.subr.bf16.mxu0 %v1295_v34 }
  0x8c   : > { %596 = vmatmul.mubr.bf16.vlgmr.msra.gmra.mrb[0].mxu0 %v1116_v32 }
  0x8d   : > { %637 = vmatmul.mubr.bf16.vlgmr.msra.gmra.mrb[0].mxu1 %v1119_v35  ;;  %990 = vmatpush3.bf16.msra.mxu0 %v1122_v37 }
  0x8e   : > { %991 = vmatprep.subr.bf16.mxu0 %v1295_v34  ;;  %1005 = vmatprep.mubr.msk.bf16.mxu0 %vm1296_vm0, %v1295_v34 }
  0x91   : > { %992 = vmatpush3.bf16.msra.mxu0 %v1123_v38 }
  0x92   : > { %993 = vmatprep.subr.bf16.mxu0 %v1295_v34 }
  0x95   : > { %994 = vmatpush3.bf16.msra.mxu0 %v1124_v39 }
  0x96   : > { %995 = vmatprep.subr.bf16.mxu0 %v1295_v34 }
  0x99   : > { %996 = vmatpush3.bf16.msra.mxu0 %v1125_v40 }
  0x9a   : > { %997 = vmatprep.subr.bf16.mxu0 %v1295_v34 }
  0x9d   : > { %998 = vmatpush3.bf16.msra.mxu0 %v1126_v41 }
  0x9e   : > { %999 = vmatprep.subr.bf16.mxu0 %v1295_v34 }
  0xa1   : > { %1000 = vmatpush3.bf16.msra.mxu0 %v1127_v42 }
  0xa2   : > { %1001 = vmatprep.subr.bf16.mxu0 %v1295_v34 }
  0xa5   : > { %1002 = vmatpush3.bf16.msra.mxu0 %v1128_v43 }
  0xa6   : > { %1003 = vmatprep.subr.bf16.mxu0 %v1295_v34 }
  0xa9   : > { %1004 = vmatpush3.bf16.msra.mxu0 %v1129_v44 }
 0x15f   : > { %v952_v45 = vpop.f32.mrb[0].mxu0 }
 0x160   : > { %v974_v46 = vpop.f32.mrb[0].mxu1  ;;  %v953_v48 = vpop.f32.mrb[1].mxu0 }
 0x161   : > { %v954_v49 = vadd.f32 %v953_v48, %v952_v45  ;;  %v975_v50 = vpop.f32.mrb[1].mxu1  ;;  %v955_v51 = vpop.f32.mrb[2].mxu0 }
 0x162   : > { %v976_v52 = vadd.f32 %v975_v50, %v974_v46  ;;  %v977_v53 = vpop.f32.mrb[2].mxu1  ;;  %v956_v54 = vpop.f32.mrb[3].mxu0 }
 0x163   : > { %v598_v55 = vadd.f32 %v954_v49, %v882_v47  ;;  %v957_v56 = vadd.f32 %v956_v54, %v955_v51  ;;  %v978_v57 = vpop.f32.mrb[3].mxu1 }
 0x164   : > { %v979_v58 = vadd.f32 %v978_v57, %v977_v53 }
 0x165   : > { %v639_v59 = vadd.f32 %v976_v52, %v598_v55  ;;  %v601_v60 = vadd.f32 %v957_v56, %v882_v47 }
 0x167   : > { %v642_v61 = vadd.f32 %v979_v58, %v601_v60  ;;  %v645_v62 = vmax.f32 %v639_v59, 0.0 }
 0x169   : > { %v646_v63 = vmax.f32 %v642_v61, 0.0 }
 0x16b   : > { %v647_v0 = vpack.c.bf16 %v646_v63, %v645_v62 }
 0x16d   : > { %1006 = vmatmul.mubr.bf16.vlgmr.msra.gmra.mrb[4].mxu0 %v647_v0 }
 0x240   : > { %v753_v2 = vpop.f32.mrb[4].mxu0 }
 0x241   : > { %v754_v3 = vadd.f32 %v919_v1, %v753_v2  ;;  %v1007_v4 = vpop.f32.mrb[5].mxu0 }
 0x242   : > { %v756_v5 = vpop.f32.mrb[6].mxu0 }
 0x243   : > { %760 = vst [vmem:[%s272_s28] sm:$0xff] %v754_v3  ;;  %v757_v6 = vadd.f32 %v919_v1, %v756_v5  ;;  %v1008_v7 = vpop.f32.mrb[7].mxu0 }
 0x245   : > { %761 = vst [vmem:[%s272_s28 + $0x8] sm:$0xff] %v757_v6 }
 0x246   : > { %1229 = shalt.err (!%p1226_p2)
}
 0x247   : > { %s1230_s24 = scalar_lea.hbm %s1533_s12, 256  ;;  %s1234_s10 = scalar_lea.hbm %s1582_s5, 512 }
 0x248   : > { %p1231_p13 = scmp.ne.s32.totalorder %s1533_s12, %s1230_s24  ;;  %p1235_p4 = scmp.lt.u32.totalorder %s1533_s12, %s1582_s5 }
 0x249   : > { %p1236_p5 = scmp.lt.u32.totalorder %s1234_s10, %s1230_s24  ;;  %p1238_p11 = scmp.lt.u32.totalorder %s1230_s24, %s1533_s12 }
 0x24a   : > { %p1232_p6 = pnand %p1231_p13, %p1596_p0 }
 0x24b   : > { %p1237_p8 = por %p1236_p5, %p1235_p4 }
 0x24c   : > { %p1233_p10 = pneg %p1232_p6 }
 0x24d   : > { %p1239_p1 = por %p1238_p11, %p1237_p8 }
 0x24f   : > { %p1240_p3 = pnand %p1239_p1, %p1233_p10 }
 0x251   : > { %1243 = shalt.err (!%p1240_p3)
}
 0x252   : > { %s1298_s15 = smov 128   ;;  %s1299_s16 = smov 8  }
 0x253   : > { %1019 = dma.vmem_to_hbm [thread:$0]  (%p1596_p0), %s1528_s30, 256, %s1533_s12, %s763_s13, %s1298_s15, %s1298_s15, %s1299_s16  }
 0x254 PF: > { %s791_s9 = sand.u32 1, %s1274_s18   ;;  %p1597_p7 = scmp.ne.s32.totalorder %s1587_s25, 0 }
 0x255   : > { %p1598_p9 = scmp.ge.s32.totalorder %s1286_s21, 2  ;;  %s792_s22 = scalar_lea.sflag [#allocation4], %s791_s9 }
 0x257   : > { %p1033_p12 = pnand %p1598_p9, %p1597_p7 }
 0x259   : > { %1269 = dma.done.wait (!%p1033_p12), %s792_s22, 256  }
 0x25a   : > { %1271 = vsyncadd (!%p1033_p12), %s792_s22, 4294967040  ;;  %p19_p2 = scmp.ge.s32.totalorder %s1440_s14, 4   ;;  %s1599_s18 = smov %s1278_s19 }
 0x25b   : > { %s1600_s19 = smov %s1282_s20  ;;  %s1601_s20 = smov %s1456_s27 }
 0x25c   : > { %s1602_s21 = smov %s1440_s14  ;;  %21 = sbr.rel (!%p19_p2) target bundleno = 6 (0x6), region = 93 }
 0x263   :  { %797 = vsyncpa [#allocation3], 1 }
 0x264   :  { %799 = vsyncpa [#allocation3 + $0x1], 1 }
 0x265   :  { %800 = vsyncpa [#allocation6], 1 }
 0x266   :  { %801 = vsyncpa [#allocation4], 1 }
 0x267   :  { %803 = vsyncpa [#allocation4 + $0x1], 1 }

</bundles_post_ra>
